<compile_context>
chip_gen: v5e
topology: v5e:2x2
jax: 0.10.0
libtpu: 0.0.40
codegen_flags: <defaults>
</compile_context>

<pallas_src>
import jax
import jax.numpy as jnp
from jax.experimental import pallas as pl
from jax.experimental.pallas import tpu as pltpu

LAYER_SIZES = [50, 16, 8, 4]
ACTIVATION = "relu"


def _round_up(n, m):
    return ((n + m - 1) // m) * m


def mlp_kernel(x_ref, w1_ref, b1_ref, w2_ref, b2_ref, w3_ref, b3_ref, o_ref):
    # Layer 1: (TM, 50)bf16 @ (50, 16)bf16 -> f32 acc, +bias, ReLU (f32)
    h = jnp.dot(x_ref[...], w1_ref[...], preferred_element_type=jnp.float32)
    h = jnp.maximum(h + b1_ref[...], 0.0)
    # Layer 2: (TM, 16) @ (16, 8) -> f32 acc, +bias, ReLU (f32)
    h = jnp.dot(h.astype(jnp.bfloat16), w2_ref[...], preferred_element_type=jnp.float32)
    h = jnp.maximum(h + b2_ref[...], 0.0)
    # Layer 3: (TM, 8) @ (8, 4) -> f32 acc, +bias (no activation on the last layer)
    h = jnp.dot(h.astype(jnp.bfloat16), w3_ref[...], preferred_element_type=jnp.float32)
    o_ref[...] = (h + b3_ref[...]).astype(o_ref.dtype)
    # TODO(synk): out_dim=4 is lane-sparse (masked vst); only worth a lane-dense
    # (B//32, 128) output slab if the profile shows store stalls.


def mlp_forward(x, params):
    (w1, b1), (w2, b2), (w3, b3) = params
    B, in_dim = x.shape
    out_dim = w3.shape[1]

    # Batch tile: multiple of 8, capped at 512 (tiny vs. any generation's VMEM:
    # a double-buffered (512, 128)-padded bf16 x tile is ~256 KiB).
    TM = min(512, _round_up(max(B, 1), 8))
    Bp = _round_up(B, TM)

    # bf16 inputs for the MXU; accumulation stays f32 inside the kernel.
    xb = x.astype(jnp.bfloat16)
    if Bp != B:
        xb = jnp.pad(xb, ((0, Bp - B), (0, 0)))

    grid = (pl.cdiv(Bp, TM),)

    # Weights/biases: full blocks, constant index_map -> VMEM-resident across the grid.
    resident = lambda a: pl.BlockSpec(a.shape, lambda i: (0,) * a.ndim)

    flops = 2 * Bp * sum(LAYER_SIZES[i] * LAYER_SIZES[i + 1]
                         for i in range(len(LAYER_SIZES) - 1))
    param_bytes = sum(int(a.size) * a.dtype.itemsize
                      for a in (w1, b1, w2, b2, w3, b3))
    bytes_accessed = Bp * in_dim * 2 + param_bytes + Bp * out_dim * 4

    out = pl.pallas_call(
        mlp_kernel,
        out_shape=jax.ShapeDtypeStruct((Bp, out_dim), jnp.float32),
        grid=grid,
        in_specs=[
            pl.BlockSpec((TM, in_dim), lambda i: (i, 0)),   # x: tiled over batch
            resident(w1), resident(b1),
            resident(w2), resident(b2),
            resident(w3), resident(b3),
        ],
        out_specs=pl.BlockSpec((TM, out_dim), lambda i: (i, 0)),
        compiler_params=pltpu.CompilerParams(
            dimension_semantics=("parallel",),
        ),
        cost_estimate=pl.CostEstimate(
            flops=flops, transcendentals=0, bytes_accessed=bytes_accessed),
    )(xb, w1, b1, w2, b2, w3, b3)

    return out[:B]


def init_params(key, layer_sizes):
    # Deterministic init mirroring nn.Linear's default (uniform +/- 1/sqrt(fan_in)).
    # Weights are stored bf16 (MXU-native); biases stay f32.
    params = []
    for i in range(len(layer_sizes) - 1):
        fan_in, fan_out = layer_sizes[i], layer_sizes[i + 1]
        key, kw, kb = jax.random.split(key, 3)
        bound = 1.0 / jnp.sqrt(fan_in)
        w = jax.random.uniform(kw, (fan_in, fan_out), jnp.float32, -bound, bound)
        b = jax.random.uniform(kb, (1, fan_out), jnp.float32, -bound, bound)
        params.append((w.astype(jnp.bfloat16), b))
    return params


def mlp_reference(x, params):
    # Same numerics as the kernel: bf16 dot inputs, f32 accumulation, f32 bias/ReLU.
    (w1, b1), (w2, b2), (w3, b3) = params
    h = x.astype(jnp.bfloat16)
    h = jnp.dot(h, w1, preferred_element_type=jnp.float32)
    h = jnp.maximum(h + b1, 0.0)
    h = jnp.dot(h.astype(jnp.bfloat16), w2, preferred_element_type=jnp.float32)
    h = jnp.maximum(h + b2, 0.0)
    h = jnp.dot(h.astype(jnp.bfloat16), w3, preferred_element_type=jnp.float32)
    return h + b3


if __name__ == "__main__":
    key = jax.random.PRNGKey(0)
    key, kx1, kx2 = jax.random.split(key, 3)
    params = init_params(key, LAYER_SIZES)

    # Small case (single tile).
    batch = 8
    x = jax.random.normal(kx1, (batch, LAYER_SIZES[0]), jnp.float32)
    out = jax.block_until_ready(mlp_forward(x, params))
    ref = mlp_reference(x, params)
    assert out.shape == (batch, LAYER_SIZES[-1])
    assert jnp.allclose(out, ref, atol=1e-3, rtol=1e-3)

    # Larger, non-divisible batch: exercises the multi-tile grid + padding path.
    batch2 = 1000
    x2 = jax.random.normal(kx2, (batch2, LAYER_SIZES[0]), jnp.float32)
    out2 = jax.block_until_ready(mlp_forward(x2, params))
    ref2 = mlp_reference(x2, params)
    assert out2.shape == (batch2, LAYER_SIZES[-1])
    assert jnp.allclose(out2, ref2, atol=1e-3, rtol=1e-3)

    print("KERNEL_OK")
</pallas_src>

<mosaic_0001>
module attributes {stable_mosaic.version = 11 : i64} {
  func.func @mlp_kernel(%arg0: i32, %arg1: memref<8x50xbf16, #tpu.memory_space<vmem>>, %arg2: memref<50x16xbf16, #tpu.memory_space<vmem>>, %arg3: memref<1x16xf32, #tpu.memory_space<vmem>>, %arg4: memref<16x8xbf16, #tpu.memory_space<vmem>>, %arg5: memref<1x8xf32, #tpu.memory_space<vmem>>, %arg6: memref<8x4xbf16, #tpu.memory_space<vmem>>, %arg7: memref<1x4xf32, #tpu.memory_space<vmem>>, %arg8: memref<8x4xf32, #tpu.memory_space<vmem>>) attributes {dimension_semantics = [#tpu.dimension_semantics<parallel>], iteration_bounds = array<i64: 1>, scalar_prefetch = 0 : i64, scratch_operands = 0 : i64, tpu.core_type = #tpu.core_type<tc>, window_params = [{transform_indices = @transform_0, window_bounds = array<i64: 8, 50>}, {pipeline_mode = #tpu.pipeline_mode<synchronous>, transform_indices = @transform_1, window_bounds = array<i64: 50, 16>}, {pipeline_mode = #tpu.pipeline_mode<synchronous>, transform_indices = @transform_2, window_bounds = array<i64: 1, 16>}, {pipeline_mode = #tpu.pipeline_mode<synchronous>, transform_indices = @transform_3, window_bounds = array<i64: 16, 8>}, {pipeline_mode = #tpu.pipeline_mode<synchronous>, transform_indices = @transform_4, window_bounds = array<i64: 1, 8>}, {pipeline_mode = #tpu.pipeline_mode<synchronous>, transform_indices = @transform_5, window_bounds = array<i64: 8, 4>}, {pipeline_mode = #tpu.pipeline_mode<synchronous>, transform_indices = @transform_6, window_bounds = array<i64: 1, 4>}, {transform_indices = @transform_7, window_bounds = array<i64: 8, 4>}]} {
    %c0 = arith.constant 0 : index
    %c0_0 = arith.constant 0 : index
    %0 = vector.load %arg1[%c0, %c0_0] : memref<8x50xbf16, #tpu.memory_space<vmem>>, vector<8x50xbf16>
    %c0_1 = arith.constant 0 : index
    %c0_2 = arith.constant 0 : index
    %1 = vector.load %arg2[%c0_1, %c0_2] : memref<50x16xbf16, #tpu.memory_space<vmem>>, vector<50x16xbf16>
    %cst = arith.constant dense<0.000000e+00> : vector<8x16xf32>
    %2 = tpu.matmul %0, %1, %cst {dimension_numbers = #tpu.dot_dimension_numbers<[1], [0], [0], [1], [0, 0, 1, 1], [], []>} : vector<8x50xbf16>, vector<50x16xbf16>, vector<8x16xf32> -> vector<8x16xf32>
    %c0_3 = arith.constant 0 : index
    %c0_4 = arith.constant 0 : index
    %3 = vector.load %arg3[%c0_3, %c0_4] : memref<1x16xf32, #tpu.memory_space<vmem>>, vector<1x16xf32>
    %4 = vector.broadcast %3 : vector<1x16xf32> to vector<8x16xf32>
    %5 = arith.addf %2, %4 : vector<8x16xf32>
    %cst_5 = arith.constant 0.000000e+00 : f32
    %6 = vector.broadcast %cst_5 : f32 to vector<8x16xf32>
    %7 = arith.maximumf %5, %6 : vector<8x16xf32>
    %8 = arith.truncf %7 : vector<8x16xf32> to vector<8x16xbf16>
    %c0_6 = arith.constant 0 : index
    %c0_7 = arith.constant 0 : index
    %9 = vector.load %arg4[%c0_6, %c0_7] : memref<16x8xbf16, #tpu.memory_space<vmem>>, vector<16x8xbf16>
    %cst_8 = arith.constant dense<0.000000e+00> : vector<8x8xf32>
    %10 = tpu.matmul %8, %9, %cst_8 {dimension_numbers = #tpu.dot_dimension_numbers<[1], [0], [0], [1], [0, 0, 1, 1], [], []>} : vector<8x16xbf16>, vector<16x8xbf16>, vector<8x8xf32> -> vector<8x8xf32>
    %c0_9 = arith.constant 0 : index
    %c0_10 = arith.constant 0 : index
    %11 = vector.load %arg5[%c0_9, %c0_10] : memref<1x8xf32, #tpu.memory_space<vmem>>, vector<1x8xf32>
    %12 = vector.broadcast %11 : vector<1x8xf32> to vector<8x8xf32>
    %13 = arith.addf %10, %12 : vector<8x8xf32>
    %cst_11 = arith.constant 0.000000e+00 : f32
    %14 = vector.broadcast %cst_11 : f32 to vector<8x8xf32>
    %15 = arith.maximumf %13, %14 : vector<8x8xf32>
    %16 = arith.truncf %15 : vector<8x8xf32> to vector<8x8xbf16>
    %c0_12 = arith.constant 0 : index
    %c0_13 = arith.constant 0 : index
    %17 = vector.load %arg6[%c0_12, %c0_13] : memref<8x4xbf16, #tpu.memory_space<vmem>>, vector<8x4xbf16>
    %cst_14 = arith.constant dense<0.000000e+00> : vector<8x4xf32>
    %18 = tpu.matmul %16, %17, %cst_14 {dimension_numbers = #tpu.dot_dimension_numbers<[1], [0], [0], [1], [0, 0, 1, 1], [], []>} : vector<8x8xbf16>, vector<8x4xbf16>, vector<8x4xf32> -> vector<8x4xf32>
    %c0_15 = arith.constant 0 : index
    %c0_16 = arith.constant 0 : index
    %19 = vector.load %arg7[%c0_15, %c0_16] : memref<1x4xf32, #tpu.memory_space<vmem>>, vector<1x4xf32>
    %20 = vector.broadcast %19 : vector<1x4xf32> to vector<8x4xf32>
    %21 = arith.addf %18, %20 : vector<8x4xf32>
    %c0_17 = arith.constant 0 : index
    %c0_18 = arith.constant 0 : index
    %22 = vector.load %arg8[%c0_17, %c0_18] : memref<8x4xf32, #tpu.memory_space<vmem>>, vector<8x4xf32>
    tpu.vector_store %arg8[%c0_17, %c0_18], %21 {strides = array<i32>} : memref<8x4xf32, #tpu.memory_space<vmem>>, vector<8x4xf32>,
    return
  }
  func.func @transform_0(%arg0: i32) -> (i32, i32) {
    %c0_i32 = arith.constant 0 : i32
    %c0_i32_0 = arith.constant 0 : i32
    return %arg0, %c0_i32 : i32, i32
  }
  func.func @transform_1(%arg0: i32) -> (i32, i32) {
    %c0_i32 = arith.constant 0 : i32
    %c0_i32_0 = arith.constant 0 : i32
    %c0_i32_1 = arith.constant 0 : i32
    return %c0_i32, %c0_i32_0 : i32, i32
  }
  func.func @transform_2(%arg0: i32) -> (i32, i32) {
    %c0_i32 = arith.constant 0 : i32
    %c0_i32_0 = arith.constant 0 : i32
    %c0_i32_1 = arith.constant 0 : i32
    return %c0_i32, %c0_i32_0 : i32, i32
  }
  func.func @transform_3(%arg0: i32) -> (i32, i32) {
    %c0_i32 = arith.constant 0 : i32
    %c0_i32_0 = arith.constant 0 : i32
    %c0_i32_1 = arith.constant 0 : i32
    return %c0_i32, %c0_i32_0 : i32, i32
  }
  func.func @transform_4(%arg0: i32) -> (i32, i32) {
    %c0_i32 = arith.constant 0 : i32
    %c0_i32_0 = arith.constant 0 : i32
    %c0_i32_1 = arith.constant 0 : i32
    return %c0_i32, %c0_i32_0 : i32, i32
  }
  func.func @transform_5(%arg0: i32) -> (i32, i32) {
    %c0_i32 = arith.constant 0 : i32
    %c0_i32_0 = arith.constant 0 : i32
    %c0_i32_1 = arith.constant 0 : i32
    return %c0_i32, %c0_i32_0 : i32, i32
  }
  func.func @transform_6(%arg0: i32) -> (i32, i32) {
    %c0_i32 = arith.constant 0 : i32
    %c0_i32_0 = arith.constant 0 : i32
    %c0_i32_1 = arith.constant 0 : i32
    return %c0_i32, %c0_i32_0 : i32, i32
  }
  func.func @transform_7(%arg0: i32) -> (i32, i32) {
    %c0_i32 = arith.constant 0 : i32
    %c0_i32_0 = arith.constant 0 : i32
    return %arg0, %c0_i32 : i32, i32
  }
}

</mosaic_0001>

<bundles_post_ra>
// kernel: tpu_custom_call.1
= control target key start
LH: loop header
LB: loop body
LE: loop exit
PB: predicated region body
PF: predicated region fallthrough
CT: control target
= control target key end

     0   :  { %vm64_vm0 = vcmask 1040384   ;;  %vm60_vm1 = vcmask 408576   ;;  %vm95_vm2 = vcmask 130048   ;;  %vm123_vm3 = vcmask 1043456   ;;  %s245_s1 = inlined_call_operand.vmem [shape: bf16[50,16], index: 1, kind: input, shape index: {}]   ;;  %s246_s2 = inlined_call_operand.vmem [shape: f32[1,16], index: 2, kind: input, shape index: {}]   ;;  %s247_s0 = inlined_call_operand.vmem [shape: bf16[8,50], index: 0, kind: input, shape index: {}]   ;;  %s248_s4 = inlined_call_operand.vmem [shape: f32[1,8], index: 4, kind: input, shape index: {}]   ;;  %s249_s3 = inlined_call_operand.vmem [shape: bf16[16,8], index: 3, kind: input, shape index: {}]   ;;  %s250_s6 = inlined_call_operand.vmem [shape: f32[1,4], index: 6, kind: input, shape index: {}]   ;;  %s251_s5 = inlined_call_operand.vmem [shape: bf16[8,4], index: 5, kind: input, shape index: {}]   ;;  %s252_s7 = inlined_call_operand.vmem [shape: f32[8,4], index: 7, kind: output, shape index: {}]  }
   0x1   :  { %v34_v0 = vld [vmem:[%s245_s1 + $0x18] sm:$0x1]  ;;  %v167_v4 = vld [vmem:[%s245_s1 + $0x10] sm:$0xff]  ;;  %v166_v5 = vld [vmem:[%s245_s1 + $0x8] sm:$0xff]  ;;  %vm119_vm4 = vcmask 64512   ;;  %vm140_vm5 = vcmask 31744  }
   0x2   :  { %v52_v1 = vunpack.c.l.b16 %v34_v0  ;;  %v165_v6 = vld [vmem:[%s245_s1] sm:$0xff] }
   0x3   :  { %v27_v7 = vld [vmem:[%s247_s0] sm:$0xf] }
   0x4   :  { %v56_v2 = vpack.c.b16 %v52_v1, %v52_v1  ;;  %v168_v8 = vld [vmem:[%s249_s3] sm:$0xff] }
   0x5   :  { %106 = vmatpush.bf16.msra.mxu1 %v168_v8  ;;  %v169_v9 = vld [vmem:[%s246_s2] ss:$0 sm:$0xff] }
   0x6   :  { %v66_v3 = vsel %vm64_vm0, %v56_v2, 0  ;;  %v114_v15 = vld [vmem:[%s251_s5] sm:$0xf] }
   0x7   :  { %72 = vmatpush.bf16.msra.mxu0 %v66_v3  ;;  %v125_v16 = vsel %vm123_vm3, %v114_v15, 0  ;;  %v170_v17 = vld [vmem:[%s248_s4] ss:$0 sm:$0xff] }
   0x8   :  { %134 = vmatpush.bf16.msra.mxu2 %v125_v16  ;;  %v171_v23 = vld [vmem:[%s250_s6] ss:$0 sm:$0xff] }
   0xb   :  { %73 = vmatpush.bf16.msra.mxu0 %v167_v4 }
   0xf   :  { %74 = vmatpush.bf16.msra.mxu0 %v166_v5 }
  0x13   :  { %75 = vmatpush.bf16.msra.mxu0 %v165_v6 }
  0x16   :  { %158 = vmatmul.msk.bf16.vlgmr.msra.gmra.mxu0 %vm60_vm1, %v27_v7 }
  0x93   :  { %v77_v10 = vpop.f32.mrf.mxu0 }
  0x94   :  { %v78_v11 = vadd.f32 %v169_v9, %v77_v10 }
  0x96   :  { %v81_v12 = vmax.f32 %v78_v11, 0.0 }
  0x98   :  { %v82_v13 = vpack.c.bf16 %v81_v12, %v81_v12 }
  0x9a   :  { %163 = vmatmul.msk.bf16.vlgmr.msra.gmra.mxu1 %vm95_vm2, %v82_v13 }
  0x9b   :  { %v79_v14 = vpop.f32.mrf.mxu0 }
 0x117   :  { %v108_v18 = vpop.f32.mrf.mxu1 }
 0x118   :  { %v109_v19 = vadd.f32 %v170_v17, %v108_v18 }
 0x11a   :  { %v112_v20 = vmax.f32 %v109_v19, 0.0 }
 0x11c   :  { %v113_v21 = vpack.c.bf16 %v112_v20, %v112_v20 }
 0x11e   :  { %164 = vmatmul.msk.bf16.vlgmr.msra.gmra.mxu2 %vm119_vm4, %v113_v21 }
 0x11f   :  { %v110_v22 = vpop.f32.mrf.mxu1 }
 0x1a1   :  { %v136_v24 = vpop.f32.mrf.mxu2 }
 0x1a2   :  { %v137_v25 = vadd.f32 %v171_v23, %v136_v24 }
 0x1a4   :  { %141 = vst.msk [vmem:[%s252_s7] sm:$0xff] %vm140_vm5, %v137_v25 }
 0x1a9   :  { %v138_v26 = vpop.f32.mrf.mxu2 }

</bundles_post_ra>
